<compile_context>
chip_gen: v6e
topology: v6e:2x2x1
jax: 0.10.0
libtpu: 0.0.40
codegen_flags: <defaults>
</compile_context>

<pallas_src>
import functools

import jax
import jax.numpy as jnp
from jax import lax
from jax.experimental import pallas as pl
from jax.experimental.pallas import tpu as pltpu


def _round_up(a, b):
    return ((a + b - 1) // b) * b


def _center_loss_gather_kernel(labels_ref, x_ref, centers_ref, out_ref,
                               c_gather, sem, *, tb):
    """Per batch tile: gather c_{y_i} rows from HBM, emit ||x_i - c_{y_i}||^2."""
    bi = pl.program_id(0)
    base = bi * tb

    # Issue one row-gather DMA per batch row: centers[labels[base + r]] -> c_gather[r].
    @pl.loop(0, tb)
    def _(r):
        lab = labels_ref[base + r]
        pltpu.make_async_copy(
            centers_ref.at[pl.ds(lab, 1)],
            c_gather.at[pl.ds(r, 1)],
            sem.at[0],
        ).start()

    # Wait for all tb copies (equal-sized transfers sharing one semaphore, so
    # tb waits consume exactly the tb completions regardless of order).
    @pl.loop(0, tb)
    def _(r):
        pltpu.make_async_copy(
            centers_ref.at[pl.ds(0, 1)],
            c_gather.at[pl.ds(r, 1)],
            sem.at[0],
        ).wait()

    diff = x_ref[...].astype(jnp.float32) - c_gather[...].astype(jnp.float32)
    out_ref[...] = jnp.sum(diff * diff, axis=1, keepdims=True)     # (tb, 1)


def center_loss(x, centers, labels, *, tb=256,
                vmem_budget_bytes=24 * 1024 * 1024):
    """x: (B, D), centers: (C, D), labels: (B,) int -> scalar f32 loss."""
    B, D = x.shape
    C, Dc = centers.shape
    assert D == Dc and labels.shape == (B,)

    # --- batch tile size selection -------------------------------------
    tb = max(8, (int(tb) // 8) * 8)
    # VMEM cap: 2x double-buffered x tile + gathered-centers tile per row.
    row_bytes = 2 * D * x.dtype.itemsize + D * centers.dtype.itemsize
    tb_cap = max(8, (int(vmem_budget_bytes // row_bytes) // 8) * 8)
    tb = min(tb, tb_cap)
    # Never tile beyond the (padded) batch.
    tb = min(tb, _round_up(B, 8))
    # Prefer >= 2 batch tiles so the "parallel" axis can feed both v7x cores.
    if B > 8:
        tb = min(tb, _round_up((B + 1) // 2, 8))
    tb = max(8, tb)

    b_pad = _round_up(B, tb)
    nb = b_pad // tb

    labels_i32 = labels.astype(jnp.int32)
    if b_pad == B:
        x_p, labels_p = x, labels_i32
    else:
        # Padded rows gather centers[0] (valid index, no DMA OOB) and are
        # discarded by the [:B] slice below.
        x_p = jnp.pad(x, ((0, b_pad - B), (0, 0)))
        labels_p = jnp.pad(labels_i32, (0, b_pad - B))

    kernel = functools.partial(_center_loss_gather_kernel, tb=tb)

    dists = pl.pallas_call(
        kernel,
        out_shape=jax.ShapeDtypeStruct((b_pad, 1), jnp.float32),
        grid_spec=pltpu.PrefetchScalarGridSpec(
            num_scalar_prefetch=1,            # labels -> SMEM, drives the gather
            grid=(nb,),
            in_specs=[
                pl.BlockSpec((tb, D), lambda bi, lab: (bi, 0)),   # x batch tile
                pl.BlockSpec(memory_space=pl.ANY),                # centers stay in HBM
            ],
            out_specs=pl.BlockSpec((tb, 1), lambda bi, lab: (bi, 0)),
            scratch_shapes=[
                pltpu.VMEM((tb, D), centers.dtype),               # gathered c_{y_i}
                pltpu.SemaphoreType.DMA((1,)),
            ],
        ),
        compiler_params=pltpu.CompilerParams(
            dimension_semantics=("parallel",),
            vmem_limit_bytes=32 * 1024 * 1024,
        ),
    )(labels_p, x_p, centers)

    d = dists[:B, 0]
    matched = jnp.sum(jnp.clip(d, 1e-12, 1e12))
    # Analytic contribution of the B*(C-1) masked (zeroed-then-clamped) entries.
    floor = jnp.float32(B) * jnp.float32(C - 1) * jnp.float32(1e-12)
    return (matched + floor) / jnp.float32(B)


def center_loss_ref(x, centers, labels):
    """Pure-JAX reference mirroring the torch module (full distmat + mask + clamp)."""
    B = x.shape[0]
    C = centers.shape[0]
    distmat = (
        jnp.sum(x**2, axis=1, keepdims=True)
        + jnp.sum(centers**2, axis=1, keepdims=True).T
        - 2.0 * jnp.dot(x, centers.T, precision=lax.Precision.HIGHEST)
    )
    mask = (labels[:, None] == jnp.arange(C)[None, :]).astype(jnp.float32)
    dist = jnp.clip(distmat * mask, 1e-12, 1e12)
    return jnp.sum(dist) / B


if __name__ == "__main__":
    key = jax.random.PRNGKey(0)
    k1, k2, k3, k4, k5, k6 = jax.random.split(key, 6)

    # Case 1: tiny shapes consistent with the module (reduced feat_dim / classes).
    B1, C1, D1 = 8, 16, 128
    x1 = jax.random.normal(k1, (B1, D1), dtype=jnp.float32)
    cent1 = jax.random.normal(k2, (C1, D1), dtype=jnp.float32)   # torch.randn centers
    lab1 = jax.random.randint(k3, (B1,), 0, C1, dtype=jnp.int32)
    out1 = jax.block_until_ready(center_loss(x1, cent1, lab1))
    ref1 = jax.block_until_ready(center_loss_ref(x1, cent1, lab1))
    assert jnp.allclose(out1, ref1, rtol=1e-4, atol=1e-4), (out1, ref1)

    # Case 2: batch not a multiple of 8 (exercises padding + two "parallel"
    # batch tiles) and a larger class count, so the gather reads only 12 of
    # the 160 center rows.
    B2, C2, D2 = 12, 160, 256
    x2 = jax.random.normal(k4, (B2, D2), dtype=jnp.float32)
    cent2 = jax.random.normal(k5, (C2, D2), dtype=jnp.float32)
    lab2 = jax.random.randint(k6, (B2,), 0, C2, dtype=jnp.int32)
    out2 = jax.block_until_ready(center_loss(x2, cent2, lab2))
    ref2 = jax.block_until_ready(center_loss_ref(x2, cent2, lab2))
    assert jnp.allclose(out2, ref2, rtol=1e-4, atol=1e-4), (out2, ref2)

    print("KERNEL_OK")
</pallas_src>

<mosaic_0001>
module attributes {stable_mosaic.version = 11 : i64} {
  func.func @_center_loss_gather_kernel(%arg0: i32, %arg1: memref<8xi32, #tpu.memory_space<smem>>, %arg2: memref<8x128xf32, #tpu.memory_space<vmem>>, %arg3: memref<16x128xf32, #tpu.memory_space<any>>, %arg4: memref<8x1xf32, #tpu.memory_space<vmem>>, %arg5: memref<8x128xf32, #tpu.memory_space<vmem>>, %arg6: memref<1x!tpu.dma_semaphore, #tpu.memory_space<semaphore_mem>>) attributes {dimension_semantics = [#tpu.dimension_semantics<parallel>], iteration_bounds = array<i64: 1>, scalar_prefetch = 1 : i64, scratch_operands = 2 : i64, tpu.core_type = #tpu.core_type<tc>, window_params = [{transform_indices = @transform_0, window_bounds = array<i64: 8, 128>}, {}, {transform_indices = @transform_2, window_bounds = array<i64: 8, 1>}]} {
    %c8_i32 = arith.constant 8 : i32
    %0 = arith.muli %arg0, %c8_i32 : i32
    %c0_i32 = arith.constant 0 : i32
    %c8_i32_0 = arith.constant 8 : i32
    %1 = arith.addi %c0_i32, %c8_i32_0 : i32
    %c1_i32 = arith.constant 1 : i32
    scf.for %arg7 = %c0_i32 to %1 step %c1_i32  : i32 {
      %c1_i32_11 = arith.constant 1 : i32
      %10 = arith.muli %arg7, %c1_i32_11 : i32
      %c0_i32_12 = arith.constant 0 : i32
      %11 = arith.addi %c0_i32_12, %10 : i32
      %12 = arith.addi %0, %11 : i32
      %13 = arith.index_cast %12 : i32 to index
      %14 = memref.load %arg1[%13] : memref<8xi32, #tpu.memory_space<smem>>
      %c0_i32_13 = arith.constant 0 : i32
      %c0_i32_14 = arith.constant 0 : i32
      %15 = tpu.memref_slice %arg3[%14, %c0_i32_14] : memref<16x128xf32, #tpu.memory_space<any>> -> memref<1x128xf32, #tpu.memory_space<any>>
      %c0_i32_15 = arith.constant 0 : i32
      %16 = tpu.memref_slice %arg5[%11, %c0_i32_15] : memref<8x128xf32, #tpu.memory_space<vmem>> -> memref<1x128xf32, #tpu.memory_space<vmem>>
      %17 = tpu.memref_slice %arg6[%c0_i32_13] : memref<1x!tpu.dma_semaphore, #tpu.memory_space<semaphore_mem>> -> memref<1x!tpu.dma_semaphore, #tpu.memory_space<semaphore_mem>>
      %18 = tpu.memref_squeeze %17 : memref<1x!tpu.dma_semaphore, #tpu.memory_space<semaphore_mem>> -> memref<!tpu.dma_semaphore, #tpu.memory_space<semaphore_mem>>
      tpu.enqueue_dma source(%15 : memref<1x128xf32, #tpu.memory_space<any>>) target(%16 : memref<1x128xf32, #tpu.memory_space<vmem>>) target_semaphore(%18 : memref<!tpu.dma_semaphore, #tpu.memory_space<semaphore_mem>>)
    }
    %c8_i32_1 = arith.constant 8 : i32
    %c0_i32_2 = arith.constant 0 : i32
    %c8_i32_3 = arith.constant 8 : i32
    %2 = arith.addi %c0_i32_2, %c8_i32_3 : i32
    %c1_i32_4 = arith.constant 1 : i32
    scf.for %arg7 = %c0_i32_2 to %2 step %c1_i32_4  : i32 {
      %c1_i32_11 = arith.constant 1 : i32
      %10 = arith.muli %arg7, %c1_i32_11 : i32
      %c0_i32_12 = arith.constant 0 : i32
      %11 = arith.addi %c0_i32_12, %10 : i32
      %c0_i32_13 = arith.constant 0 : i32
      %c0_i32_14 = arith.constant 0 : i32
      %c0_i32_15 = arith.constant 0 : i32
      %12 = tpu.memref_slice %arg3[%c0_i32_14, %c0_i32_15] : memref<16x128xf32, #tpu.memory_space<any>> -> memref<1x128xf32, #tpu.memory_space<any>>
      %c0_i32_16 = arith.constant 0 : i32
      %13 = tpu.memref_slice %arg5[%11, %c0_i32_16] : memref<8x128xf32, #tpu.memory_space<vmem>> -> memref<1x128xf32, #tpu.memory_space<vmem>>
      %14 = tpu.memref_slice %arg6[%c0_i32_13] : memref<1x!tpu.dma_semaphore, #tpu.memory_space<semaphore_mem>> -> memref<1x!tpu.dma_semaphore, #tpu.memory_space<semaphore_mem>>
      %15 = tpu.memref_squeeze %14 : memref<1x!tpu.dma_semaphore, #tpu.memory_space<semaphore_mem>> -> memref<!tpu.dma_semaphore, #tpu.memory_space<semaphore_mem>>
      tpu.wait_dma2 semaphore(%15 : memref<!tpu.dma_semaphore, #tpu.memory_space<semaphore_mem>>) src(%12 : memref<1x128xf32, #tpu.memory_space<any>>) dst(%13 : memref<1x128xf32, #tpu.memory_space<vmem>>)
    }
    %c8_i32_5 = arith.constant 8 : i32
    %c0 = arith.constant 0 : index
    %c0_6 = arith.constant 0 : index
    %3 = vector.load %arg2[%c0, %c0_6] : memref<8x128xf32, #tpu.memory_space<vmem>>, vector<8x128xf32>
    %c0_7 = arith.constant 0 : index
    %c0_8 = arith.constant 0 : index
    %4 = vector.load %arg5[%c0_7, %c0_8] : memref<8x128xf32, #tpu.memory_space<vmem>>, vector<8x128xf32>
    %5 = arith.subf %3, %4 : vector<8x128xf32>
    %6 = arith.mulf %5, %5 : vector<8x128xf32>
    %cst = arith.constant dense<0.000000e+00> : vector<8xf32>
    %7 = vector.multi_reduction <add>, %6, %cst [1] : vector<8x128xf32> to vector<8xf32>
    %8 = vector.shape_cast %7 : vector<8xf32> to vector<8x1xf32>
    %c0_9 = arith.constant 0 : index
    %c0_10 = arith.constant 0 : index
    %9 = vector.load %arg4[%c0_9, %c0_10] : memref<8x1xf32, #tpu.memory_space<vmem>>, vector<8x1xf32>
    tpu.vector_store %arg4[%c0_9, %c0_10], %8 {strides = array<i32>} : memref<8x1xf32, #tpu.memory_space<vmem>>, vector<8x1xf32>,
    return
  }
  func.func @transform_0(%arg0: i32, %arg1: memref<8xi32, #tpu.memory_space<smem>>) -> (i32, i32) {
    %c0_i32 = arith.constant 0 : i32
    %c0_i32_0 = arith.constant 0 : i32
    return %arg0, %c0_i32 : i32, i32
  }
  func.func @transform_2(%arg0: i32, %arg1: memref<8xi32, #tpu.memory_space<smem>>) -> (i32, i32) {
    %c0_i32 = arith.constant 0 : i32
    %c0_i32_0 = arith.constant 0 : i32
    return %arg0, %c0_i32 : i32, i32
  }
}

</mosaic_0001>

<bundles_post_ra>
// kernel: tpu_custom_call.1
= control target key start
LH: loop header
LB: loop body
LE: loop exit
PB: predicated region body
PF: predicated region fallthrough
CT: control target
= control target key end

     0   :  { %s182_s12 = smov [#allocation5]   ;;  %s233_s0 = inlined_call_operand.hbm [shape: s32[8], index: 0, kind: input, shape index: {}]   ;;  %s234_s1 = inlined_call_operand.hbm [shape: f32[8,128], index: 1, kind: input, shape index: {}]   ;;  %s235_s2 = inlined_call_operand.hbm [shape: f32[16,128], index: 2, kind: input, shape index: {}]   ;;  %s236_s3 = inlined_call_operand.vmem [shape: f32[8,1], index: 3, kind: output, shape index: {}]  }
   0x1   :  { %9 = dma.hbm_to_smem %s233_s0, 16, %s182_s12, [#allocation4] }
   0x2   :  { %168 = dma.done.wait [#allocation4], 16 }
   0x3   :  { %169 = vsyncadd [#allocation4], 4294967280 }
   0x4   :  { %11 = sfence }
   0x5   :  { %12 = vsyncpa [#allocation7], 0  ;;  %s183_s15 = smov [#allocation6]  }
   0x6   :  { %s19_s16 = sshll.u32 %s183_s15, 4  ;;  %s20_s16 = int_to_ptr.vmem [resolvable:$true] %s19_s16 }
   0x7   :  { %s126_s17 = scalar_lea.vmem %s20_s16, 128  ;;  %p131_p1 = scmp.lt.s32.totalorder %s20_s16, %s20_s16 }
   0x8   :  { %p127_p0 = scmp.ne.s32.totalorder %s20_s16, %s126_s17  ;;  %p132_p2 = scmp.lt.s32.totalorder %s126_s17, %s126_s17 }
   0xa   :  { %p133_p3 = por %p132_p2, %p131_p1 }
   0xc   :  { %p134_p4 = pnand %p133_p3, %p127_p0 }
   0xe   :  { %137 = shalt.err (!%p134_p4)
}
   0xf   :  { %22 = dma.hbm_to_vmem [thread:$0]  %s234_s1, 128, %s20_s16, [#allocation7]  }
  0x10   :  { %170 = dma.done.wait [#allocation7], 128  }
  0x11   :  { %171 = vsyncadd [#allocation7], 4294967168  ;;  %s211_s0 = smov 0  }
  0x12 LB: > { %s34_s20 = sld [smem:[#allocation5 + %s176_s0]]  ;;  %s37_s21 = scalar_lea.vmem [#allocation2], %s176_s0  ;;  %s176_s0 = sphi %s211_s0, %s32_s0  }
  0x13   : > { %s45_s22 = sshll.u32 %s37_s21, 4  ;;  %s140_s29 = scalar_lea.hbm %s235_s2, 256  ;;  %s46_s22 = int_to_ptr.vmem [resolvable:$true] %s45_s22 }
  0x18   : > { %s90_s23 = sshll.u32 %s34_s20, 4 }
  0x19   : > { %s36_s1 = scalar_lea.hbm %s235_s2, %s90_s23 }
  0x1a   : > { %s138_s26 = scalar_lea.hbm %s36_s1, 16  ;;  %p141_p6 = scmp.lt.s32.totalorder %s36_s1, %s235_s2 }
  0x1b   : > { %p139_p5 = scmp.ne.s32.totalorder %s36_s1, %s138_s26  ;;  %p142_p7 = scmp.lt.s32.totalorder %s140_s29, %s138_s26 }
  0x1d   : > { %p143_p8 = por %p142_p7, %p141_p6 }
  0x1f   : > { %p144_p9 = pnand %p143_p8, %p139_p5 }
  0x21   : > { %147 = shalt.err (!%p144_p9)  }
  0x22   : > { %s148_s5 = scalar_lea.vmem %s46_s22, 16  ;;  %s184_s6 = smov [#allocation2]  }
  0x23   : > { %p149_p10 = scmp.ne.s32.totalorder %s46_s22, %s148_s5  ;;  %s150_s7 = sshll.u32 %s184_s6, 4  ;;  %s151_s7 = int_to_ptr.vmem [resolvable:$false] %s150_s7 }
  0x24   : > { %s152_s8 = scalar_lea.vmem %s151_s7, 128  ;;  %p153_p11 = scmp.lt.s32.totalorder %s46_s22, %s151_s7 }
  0x25   : > { %p154_p12 = scmp.lt.s32.totalorder %s152_s8, %s148_s5 }
  0x27   : > { %p155_p13 = por %p154_p12, %p153_p11 }
  0x29   : > { %p156_p0 = pnand %p155_p13, %p149_p10 }
  0x2b   : > { %159 = shalt.err (!%p156_p0)  }
  0x2c   : > { %48 = dma.hbm_to_vmem [thread:$0]  %s36_s1, 16, %s46_s22, [#allocation3] }
  0x2d   : > { %s32_s0 = sadd.s32 1, %s176_s0  }
  0x2e   : > { %p29_p1 = scmp.ge.s32.totalorder %s32_s0, 8  }
  0x2f   :  { %s178_s9 = smov (%p29_p1), 0  }
  0x30   :  { %31 = sbr.rel (!%p29_p1) target bundleno = 18 (0x12), region = 48 }
  0x35 LB: > { %172 = dma.done.wait [#allocation3], 16  ;;  %s180_s9 = sphi %s178_s9, %s54_s9  }
  0x36   : > { %173 = vsyncadd [#allocation3], 4294967280  ;;  %s54_s9 = sadd.s32 1, %s180_s9  }
  0x37   : > { %p51_p2 = scmp.ge.s32.totalorder %s54_s9, 8  }
  0x38   :  { %v58_v0 = vld [vmem:[#allocation6] sm:$0xff] (%p51_p2)  ;;  %v59_v1 = vld [vmem:[#allocation2] sm:$0xff] (%p51_p2)  ;;  %vm64_vm0 = vcmask (%p51_p2), 7168  }
  0x39   :  { %53 = sbr.rel (!%p51_p2) target bundleno = 53 (0x35), region = 59  ;;  %v60_v2 = vsub.f32 (%p51_p2), %v58_v0, %v59_v1 }
  0x3b   :  { %v61_v3 = vmul.f32 (%p51_p2), %v60_v2, %v60_v2 }
  0x3d   :  { %62 = vadd.xlane.f32.xlu0 (%p51_p2), %v61_v3 }
  0xc6   :  { %v63_v4 = vpop.xlane.xlu0 %62 }
  0xc7   :  { %65 = vst.msk [vmem:[%s236_s3] sm:$0xff] %vm64_vm0, %v63_v4 }
  0xc8   :  { %70 = vsyncpa [#allocation7], 1 }
  0xc9   :  { %71 = vsyncmov [#allocation3] }
  0xcc   :  { %s72_s2 = vpop.sfrf %71 }
  0xcd   :  { %p91_p3 = scmp.ne.s32.totalorder %s72_s2, 0 }
  0xcf   :  { %76 = shalt.err (%p91_p3)  }

</bundles_post_ra>
